<compile_context>
chip_gen: v7x
topology: tpu7x:2x2x1
jax: 0.10.0
libtpu: 0.0.40
codegen_flags: <defaults>
</compile_context>

<pallas_src>
import functools

import jax
import jax.numpy as jnp
from jax.experimental import pallas as pl
from jax.experimental.pallas import tpu as pltpu


def _round_up(v, m):
    return ((v + m - 1) // m) * m


def _layernorm_kernel(x_ref, alpha_ref, beta_ref, o_ref, *, eps, features, approx_recip):
    # x_ref: (row_tile, f_pad) block in VMEM.  Lanes >= `features` hold zeros.
    x = x_ref[...].astype(jnp.float32)
    f_pad = x.shape[-1]
    n = jnp.float32(features)

    # Row mean: padded lanes are zero, so the plain lane-axis sum is exact.
    mean = jnp.sum(x, axis=-1, keepdims=True) / n          # (tile, 1)
    d = x - mean                                            # reused for output

    # Centered sum of squares over the *real* features.  Padded lanes each
    # contribute mean^2 to the full-lane sum; subtract that exactly.
    ss = jnp.sum(d * d, axis=-1, keepdims=True)
    pad = f_pad - features
    if pad:
        ss = ss - jnp.float32(pad) * (mean * mean)
    ss = jnp.maximum(ss, 0.0)                               # guard tiny negatives

    # Unbiased (Bessel) variance -> std, matching torch.Tensor.std default.
    std = jnp.sqrt(ss / jnp.float32(features - 1))
    inv = pl.reciprocal(std + jnp.float32(eps), approx=approx_recip)  # (tile, 1)

    alpha = alpha_ref[...].astype(jnp.float32)              # (1, f_pad)
    beta = beta_ref[...].astype(jnp.float32)                # (1, f_pad)
    scale = inv * alpha                                      # single outer broadcast
    y = d * scale + beta
    o_ref[...] = y.astype(o_ref.dtype)


# VMEM budget for the double-buffered in+out data blocks (~4x one block),
# kept well inside v7x's 64 MiB physical VMEM.  The scoped limit request is
# raised above the 16/32 MiB defaults so big tiles are allowed on v5e/v6e too.
_DATA_VMEM_BUDGET = 28 * 1024 * 1024
_VMEM_LIMIT_BYTES = 48 * 1024 * 1024
_MAX_ROW_TILE = 2048


def _choose_row_tile(rows, f_pad, itemsize):
    sub = 16 if itemsize == 2 else 8  # bf16 packs 16 sublanes per vreg
    # in + out, double-buffered -> ~4 live (tile, f_pad) blocks in VMEM.
    max_tile = _DATA_VMEM_BUDGET // (4 * f_pad * max(itemsize, 4))
    tile = max(sub, (min(max_tile, _MAX_ROW_TILE) // sub) * sub)
    # Don't tile far beyond the actual number of rows.
    tile = min(tile, _round_up(rows, sub))
    # Keep >= ~4 grid steps when there is enough work (v7x megacore + pipeline).
    while tile > sub and pl.cdiv(rows, tile) < 4:
        tile = max(sub, (tile // 2 // sub) * sub)
    return tile


def layer_normalization(x2d, alpha, beta, *, eps=1e-5, approx_recip=False):
    """x2d: (rows, features); alpha/beta: (features,)."""
    rows, features = x2d.shape
    assert features >= 2, "unbiased std needs features >= 2"
    out_dtype = x2d.dtype

    # Lane-dense feature blocking: pad lane axis to a multiple of 128.
    f_pad = _round_up(max(features, 128), 128)
    if f_pad != features:
        x2d = jnp.pad(x2d, ((0, 0), (0, f_pad - features)))
        alpha = jnp.pad(alpha, (0, f_pad - features))
        beta = jnp.pad(beta, (0, f_pad - features))

    row_tile = _choose_row_tile(rows, f_pad, jnp.dtype(out_dtype).itemsize)
    rows_pad = _round_up(rows, row_tile)
    if rows_pad != rows:
        x2d = jnp.pad(x2d, ((0, rows_pad - rows), (0, 0)))

    alpha2d = alpha.reshape(1, f_pad)
    beta2d = beta.reshape(1, f_pad)

    kernel = functools.partial(
        _layernorm_kernel, eps=eps, features=features, approx_recip=approx_recip
    )
    out = pl.pallas_call(
        kernel,
        out_shape=jax.ShapeDtypeStruct((rows_pad, f_pad), out_dtype),
        grid_spec=pltpu.PrefetchScalarGridSpec(
            num_scalar_prefetch=0,
            grid=(rows_pad // row_tile,),
            in_specs=[
                pl.BlockSpec((row_tile, f_pad), lambda i: (i, 0)),
                pl.BlockSpec((1, f_pad), lambda i: (0, 0)),
                pl.BlockSpec((1, f_pad), lambda i: (0, 0)),
            ],
            out_specs=pl.BlockSpec((row_tile, f_pad), lambda i: (i, 0)),
        ),
        compiler_params=pltpu.CompilerParams(
            dimension_semantics=("parallel",),
            vmem_limit_bytes=_VMEM_LIMIT_BYTES,
        ),
    )(x2d, alpha2d, beta2d)

    if rows_pad != rows or f_pad != features:
        out = out[:rows, :features]
    return out


class Decoder:
    """JAX/Pallas port of the PyTorch Decoder module."""

    def __init__(self, features: int, layers=()):
        self.features = features
        self.layers = list(layers)  # callables (x, enc, self_mask, cross_mask) -> x
        # LayerNormalization parameters, deterministic init identical to PyTorch.
        self.alpha = jnp.ones((features,), dtype=jnp.float32)
        self.beta = jnp.zeros((features,), dtype=jnp.float32)
        self.eps = 1e-5

    def __call__(self, x, enc, self_mask=None, cross_mask=None):
        for layer in self.layers:
            x = layer(x, enc, self_mask, cross_mask)
        b, s, f = x.shape
        y2d = layer_normalization(
            x.reshape(b * s, f), self.alpha, self.beta, eps=self.eps
        )
        return y2d.reshape(b, s, f)


def _reference_layernorm(x, alpha, beta, eps=1e-5):
    mean = jnp.mean(x, axis=-1, keepdims=True)
    std = jnp.std(x, axis=-1, keepdims=True, ddof=1)  # unbiased, like torch
    return (x - mean) / (std + eps) * alpha + beta


if __name__ == "__main__":
    key = jax.random.PRNGKey(0)
    k1, k2 = jax.random.split(key)

    batch, seq, features = 2, 8, 32
    x = jax.random.normal(k1, (batch, seq, features), dtype=jnp.float32)
    enc = jax.random.normal(k2, (batch, seq, features), dtype=jnp.float32)

    decoder = Decoder(features, layers=[])  # empty layer stack (see TODO above)

    out = decoder(x, enc)
    out = jax.block_until_ready(out)

    ref = _reference_layernorm(x, decoder.alpha, decoder.beta, decoder.eps)
    assert out.shape == (batch, seq, features)
    assert jnp.allclose(out, ref, atol=2e-5, rtol=1e-5), "mismatch vs reference"

    print("KERNEL_OK")
</pallas_src>

<mosaic_0001>
module attributes {stable_mosaic.version = 11 : i64} {
  func.func @_layernorm_kernel(%arg0: i32, %arg1: memref<8x128xf32, #tpu.memory_space<vmem>>, %arg2: memref<1x128xf32, #tpu.memory_space<vmem>>, %arg3: memref<1x128xf32, #tpu.memory_space<vmem>>, %arg4: memref<8x128xf32, #tpu.memory_space<vmem>>) attributes {dimension_semantics = [#tpu.dimension_semantics<parallel>], iteration_bounds = array<i64: 2>, scalar_prefetch = 0 : i64, scratch_operands = 0 : i64, tpu.core_type = #tpu.core_type<tc>, window_params = [{transform_indices = @transform_0, window_bounds = array<i64: 8, 128>}, {pipeline_mode = #tpu.pipeline_mode<synchronous>, transform_indices = @transform_1, window_bounds = array<i64: 1, 128>}, {pipeline_mode = #tpu.pipeline_mode<synchronous>, transform_indices = @transform_2, window_bounds = array<i64: 1, 128>}, {transform_indices = @transform_3, window_bounds = array<i64: 8, 128>}]} {
    %c0 = arith.constant 0 : index
    %c0_0 = arith.constant 0 : index
    %0 = vector.load %arg1[%c0, %c0_0] : memref<8x128xf32, #tpu.memory_space<vmem>>, vector<8x128xf32>
    %cst = arith.constant dense<0.000000e+00> : vector<8xf32>
    %1 = vector.multi_reduction <add>, %0, %cst [1] : vector<8x128xf32> to vector<8xf32>
    %2 = vector.shape_cast %1 : vector<8xf32> to vector<8x1xf32>
    %cst_1 = arith.constant 3.200000e+01 : f32
    %3 = vector.broadcast %cst_1 : f32 to vector<8x1xf32>
    %4 = arith.divf %2, %3 : vector<8x1xf32>
    %5 = vector.broadcast %4 : vector<8x1xf32> to vector<8x128xf32>
    %6 = arith.subf %0, %5 : vector<8x128xf32>
    %7 = arith.mulf %6, %6 : vector<8x128xf32>
    %cst_2 = arith.constant dense<0.000000e+00> : vector<8xf32>
    %8 = vector.multi_reduction <add>, %7, %cst_2 [1] : vector<8x128xf32> to vector<8xf32>
    %9 = vector.shape_cast %8 : vector<8xf32> to vector<8x1xf32>
    %10 = arith.mulf %4, %4 : vector<8x1xf32>
    %cst_3 = arith.constant 9.600000e+01 : f32
    %11 = vector.broadcast %cst_3 : f32 to vector<8x1xf32>
    %12 = arith.mulf %11, %10 : vector<8x1xf32>
    %13 = arith.subf %9, %12 : vector<8x1xf32>
    %cst_4 = arith.constant 0.000000e+00 : f32
    %14 = vector.broadcast %cst_4 : f32 to vector<8x1xf32>
    %15 = arith.maximumf %13, %14 : vector<8x1xf32>
    %cst_5 = arith.constant 3.100000e+01 : f32
    %16 = vector.broadcast %cst_5 : f32 to vector<8x1xf32>
    %17 = arith.divf %15, %16 : vector<8x1xf32>
    %18 = math.sqrt %17 : vector<8x1xf32>
    %cst_6 = arith.constant 9.99999974E-6 : f32
    %19 = vector.broadcast %cst_6 : f32 to vector<8x1xf32>
    %20 = arith.addf %18, %19 : vector<8x1xf32>
    %21 = tpu.reciprocal %20 : vector<8x1xf32> -> vector<8x1xf32>
    %c0_7 = arith.constant 0 : index
    %c0_8 = arith.constant 0 : index
    %22 = vector.load %arg2[%c0_7, %c0_8] : memref<1x128xf32, #tpu.memory_space<vmem>>, vector<1x128xf32>
    %c0_9 = arith.constant 0 : index
    %c0_10 = arith.constant 0 : index
    %23 = vector.load %arg3[%c0_9, %c0_10] : memref<1x128xf32, #tpu.memory_space<vmem>>, vector<1x128xf32>
    %24 = vector.broadcast %21 : vector<8x1xf32> to vector<8x128xf32>
    %25 = vector.broadcast %22 : vector<1x128xf32> to vector<8x128xf32>
    %26 = arith.mulf %24, %25 : vector<8x128xf32>
    %27 = arith.mulf %6, %26 : vector<8x128xf32>
    %28 = vector.broadcast %23 : vector<1x128xf32> to vector<8x128xf32>
    %29 = arith.addf %27, %28 : vector<8x128xf32>
    %c0_11 = arith.constant 0 : index
    %c0_12 = arith.constant 0 : index
    %30 = vector.load %arg4[%c0_11, %c0_12] : memref<8x128xf32, #tpu.memory_space<vmem>>, vector<8x128xf32>
    tpu.vector_store %arg4[%c0_11, %c0_12], %29 {strides = array<i32>} : memref<8x128xf32, #tpu.memory_space<vmem>>, vector<8x128xf32>,
    return
  }
  func.func @transform_0(%arg0: i32) -> (i32, i32) {
    %c0_i32 = arith.constant 0 : i32
    %c0_i32_0 = arith.constant 0 : i32
    return %arg0, %c0_i32 : i32, i32
  }
  func.func @transform_1(%arg0: i32) -> (i32, i32) {
    %c0_i32 = arith.constant 0 : i32
    %c0_i32_0 = arith.constant 0 : i32
    %c0_i32_1 = arith.constant 0 : i32
    return %c0_i32, %c0_i32_0 : i32, i32
  }
  func.func @transform_2(%arg0: i32) -> (i32, i32) {
    %c0_i32 = arith.constant 0 : i32
    %c0_i32_0 = arith.constant 0 : i32
    %c0_i32_1 = arith.constant 0 : i32
    return %c0_i32, %c0_i32_0 : i32, i32
  }
  func.func @transform_3(%arg0: i32) -> (i32, i32) {
    %c0_i32 = arith.constant 0 : i32
    %c0_i32_0 = arith.constant 0 : i32
    return %arg0, %c0_i32 : i32, i32
  }
}

</mosaic_0001>

<bundles_post_ra>
// kernel: tpu_custom_call.1
= control target key start
LH: loop header
LB: loop body
LE: loop exit
PB: predicated region body
PF: predicated region fallthrough
CT: control target
= control target key end

     0   :  { %8 = vsyncpa [#allocation3], 0  ;;  %s667_s0 = inlined_call_operand.hbm [shape: f32[16,128], index: 0, kind: input, shape index: {}]   ;;  %s668_s1 = inlined_call_operand.vmem [shape: f32[1,128], index: 1, kind: input, shape index: {}]   ;;  %s669_s2 = inlined_call_operand.vmem [shape: f32[1,128], index: 2, kind: input, shape index: {}]   ;;  %s670_s3 = inlined_call_operand.hbm [shape: f32[16,128], index: 3, kind: output, shape index: {}]  }
   0x1   :  { %10 = vsyncpa [#allocation3 + $0x1], 0 }
   0x2   :  { %11 = vsyncpa [#allocation4], 0 }
   0x3   :  { %13 = vsyncpa [#allocation4 + $0x1], 0  ;;  %s496_s12 = smov 0   ;;  %s498_s13 = smov 0  }
   0x4   :  { %s500_s14 = smov 0   ;;  %s502_s15 = smov 0  }
   0x5 LB: > { %s517_s16 = sadd.s32 4294967295, %s472_s15   ;;  %s312_s17 = sadd.s32 4294967294, %s472_s15   ;;  %s472_s15 = sphi %s502_s15, %s685_s15   ;;  %s468_s14 = sphi %s500_s14, %s684_s14   ;;  %s464_s13 = sphi %s498_s13, %s683_s13   ;;  %s460_s12 = sphi %s496_s12, %s682_s12  }
   0x6   : > { %s521_s18 = sadd.s32 1, %s472_s15   ;;  %s26_s19 = sadd.s32 1, %s468_s14 }
   0x7   : > { %s23_s20 = ssub.s32 %s472_s15, %s521_s18  ;;  %p33_p0 = scmp.ne.s32.totalorder %s468_s14, %s464_s13 }
   0x8   : > { %p24_p1 = scmp.eq.s32.totalorder %s23_s20, 0  ;;  %p34_p2 = scmp.eq.s32.totalorder %s472_s15, 0 }
   0x9   : > { %p39_p3 = scmp.ne.s32.totalorder %s464_s13, %s460_s12  ;;  %p40_p4 = scmp.eq.s32.totalorder %s517_s16, 0 }
   0xa   : > { %s533_s21 = scalar_select %p24_p1, %s468_s14, %s26_s19  }
   0xb   : > { %p535_p5 = por %p34_p2, %p33_p0  ;;  %p539_p6 = por %p40_p4, %p39_p3 }
   0xc   : > { %p105_p7 = scmp.eq.s32.totalorder %s517_s16, 1  ;;  %p111_p8 = scmp.eq.s32.totalorder %s312_s17, 1 }
   0xd   : > { %p338_p10 = scmp.lt.s32.totalorder %s472_s15, 2  ;;  %s137_s26 = sand.u32 1, %s468_s14  }
   0xe   : > { %p546_p11 = por %p105_p7, %p33_p0  ;;  %p550_p12 = por %p111_p8, %p39_p3 }
   0xf   : > { %s316_s27 = sshll.u32 %s472_s15, 7  ;;  %s315_s28 = sshll.u32 %s137_s26, 3 }
  0x10   : > { %s674_s24 = scalar_select %p546_p11, 1, 0 }
  0x11   : > { %s675_s25 = scalar_select %p550_p12, 1, 0 }
  0x12   : > { %s559_s4 = scalar_lea.hbm %s667_s0, %s316_s27  ;;  %s141_s5 = scalar_lea.vmem [#allocation2], %s315_s28 }
  0x13   : > { %s148_s6 = sshll.u32 %s141_s5, 4  ;;  %p563_p13 = pnand %p338_p10, %p535_p5  ;;  %s567_s6 = int_to_ptr.vmem [resolvable:$true] %s148_s6 }
  0x14   : > { %s138_s8 = scalar_lea.sflag [#allocation3], %s137_s26  ;;  %s376_s9 = scalar_lea.hbm %s559_s4, 128 }
  0x15   : > { %p377_p2 = scmp.ne.s32.totalorder %s559_s4, %s376_s9  ;;  %p378_p3 = pneg %p563_p13 }
  0x16   : > { %s381_s17 = scalar_lea.hbm %s667_s0, 256  ;;  %p382_p5 = scmp.lt.u32.totalorder %s559_s4, %s667_s0 }
  0x17   : > { %p379_p4 = pnand %p378_p3, %p377_p2  ;;  %p383_p8 = scmp.lt.u32.totalorder %s381_s17, %s376_s9 }
  0x18   : > { %p385_p9 = scmp.lt.u32.totalorder %s376_s9, %s559_s4 }
  0x19   : > { %p380_p7 = pneg %p379_p4  ;;  %p384_p10 = por %p383_p8, %p382_p5 }
  0x1b   : > { %p386_p0 = por %p385_p9, %p384_p10 }
  0x1d   : > { %p387_p1 = pnand %p386_p0, %p380_p7 }
  0x1f   : > { %390 = shalt.err (!%p387_p1)
}
  0x20   : > { %s391_s22 = scalar_lea.vmem %s567_s6, 128  ;;  %s474_s26 = smov [#allocation2]  }
  0x21   : > { %p392_p2 = scmp.ne.s32.totalorder %s567_s6, %s391_s22  ;;  %s396_s27 = sshll.u32 %s474_s26, 4  ;;  %s397_s27 = int_to_ptr.vmem [resolvable:$false] %s396_s27 }
  0x22   : > { %s398_s28 = scalar_lea.vmem %s397_s27, 256  ;;  %p399_p11 = scmp.lt.s32.totalorder %s567_s6, %s397_s27 }
  0x23   : > { %p394_p4 = pnand %p392_p2, %p378_p3  ;;  %p400_p5 = scmp.lt.s32.totalorder %s398_s28, %s391_s22 }
  0x25   : > { %p395_p12 = pneg %p394_p4  ;;  %p401_p8 = por %p400_p5, %p399_p11 }
  0x27   : > { %p402_p9 = pnand %p401_p8, %p395_p12 }
  0x29   : > { %405 = shalt.err (!%p402_p9)
}
  0x2a   : > { %333 = dma.hbm_to_vmem [thread:$0]  (!%p563_p13), %s559_s4, 128, %s567_s6, %s138_s8  }
  0x2b   : > { %p677_p0 = scmp.lt.s32.totalorder %s472_s15, 3  ;;  %p678_p1 = scmp.ge.s32.totalorder %s472_s15, 1 }
  0x2d   : > { %p154_p3 = pnand %p678_p1, %p677_p0 }
  0x2e   : > { %s601_s29 = sand.u32 (!%p154_p3), 1, %s464_s13  }
  0x2f   : > { %157 = sbr.rel (%p154_p3) target bundleno = 400 (0x190), region = 32  ;;  %s318_s30 = sshll.u32 (!%p154_p3), %s601_s29, 3 }
  0x30   : > { %s160_s5 = scalar_lea.sflag (!%p154_p3), [#allocation3], %s601_s29  ;;  %s163_s7 = scalar_lea.vmem (!%p154_p3), [#allocation2], %s318_s30 }
  0x36   : > { %451 = dma.done.wait (%p539_p6), %s160_s5, 128  }
  0x37   : > { %453 = vsyncadd (%p539_p6), %s160_s5, 4294967168  ;;  %v186_v0 = vld [vmem:[%s163_s7] sm:$0xff]  ;;  %s323_s9 = sshll.u32 %s517_s16, 7  ;;  %s185_s10 = scalar_lea.vmem [#allocation5], %s318_s30 }
  0x38   : > { %187 = vadd.xlane.f32.xlu0 %v186_v0  ;;  %v320_v17 = vld [vmem:[%s668_s1] ss:$0 sm:$0xff]  ;;  %s242_s11 = sshll.u32 %s185_s10, 4  ;;  %s623_s20 = scalar_lea.hbm %s670_s3, %s323_s9  ;;  %s625_s11 = int_to_ptr.vmem [resolvable:$true] %s242_s11 }
  0x39   : > { %v321_v20 = vld [vmem:[%s669_s2] ss:$0 sm:$0xff]  ;;  %s229_s22 = scalar_lea.sflag [#allocation4], %s601_s29  ;;  %s406_s26 = scalar_lea.vmem %s625_s11, 128 }
  0x3a   : > { %p407_p6 = scmp.ne.s32.totalorder %s625_s11, %s406_s26  ;;  %p679_p11 = scmp.ne.s32.totalorder %s674_s24, 0 }
  0x3b   : > { %s475_s16 = smov [#allocation5]  }
  0x3c   : > { %p408_p12 = pnand %p407_p6, %p679_p11  ;;  %s410_s27 = sshll.u32 %s475_s16, 4  ;;  %s411_s27 = int_to_ptr.vmem [resolvable:$false] %s410_s27 }
  0x3d   : > { %s412_s28 = scalar_lea.vmem %s411_s27, 256  ;;  %p413_p7 = scmp.lt.s32.totalorder %s625_s11, %s411_s27 }
  0x3e   : > { %p409_p13 = pneg %p408_p12  ;;  %p414_p10 = scmp.lt.s32.totalorder %s412_s28, %s406_s26 }
  0x40   : > { %p415_p2 = por %p414_p10, %p413_p7 }
  0x42   : > { %p416_p4 = pnand %p415_p2, %p409_p13 }
  0xc5   : > { %v188_v1 = vpop.xlane.xlu0 %187 }
  0xc6   : > { %v190_v2 = vmul.f32 0.03125, %v188_v1 }
  0xc8   : > { %v191_v3 = vsub.f32 %v186_v0, %v190_v2  ;;  %v195_v5 = vmul.f32 %v190_v2, %v190_v2 }
  0xca   : > { %v192_v4 = vmul.f32 %v191_v3, %v191_v3  ;;  %v196_v6 = vmul.f32 96.0, %v195_v5 }
  0xcc   : > { %193 = vadd.xlane.f32.xlu0 %v192_v4 }
 0x159   : > { %v194_v7 = vpop.xlane.xlu0 %193 }
 0x15a   : > { %v197_v8 = vsub.f32 %v194_v7, %v196_v6 }
 0x15c   : > { %v198_v9 = vmax.f32 %v197_v8, 0.0 }
 0x15e   : > { %v200_v10 = vmul.f32 0.032258064, %v198_v9 }
 0x160   : > { %372 = vrsqrt.f32 %v200_v10  ;;  %vm203_vm0 = vcmp.eq.f32.partialorder %v200_v10, inf  ;;  %v206_v13 = vand.u32 2147483648, %v200_v10  ;;  %vm205_vm1 = vcmp.eq.f32.partialorder %v200_v10, 0.0 }
 0x16a   : > { %v373_v11 = vpop.eup %372 }
 0x16b   : > { %v202_v12 = vmul.f32 %v373_v11, %v200_v10 }
 0x16d   : > { %v204_v14 = vsel %vm203_vm0, %v200_v10, %v202_v12 }
 0x16e   : > { %v207_v15 = vsel %vm205_vm1, %v206_v13, %v204_v14 }
 0x16f   : > { %v208_v16 = vadd.f32 1e-05, %v207_v15 }
 0x171   : > { %374 = vrcp.f32 %v208_v16 }
 0x17b   : > { %v375_v18 = vpop.eup %374 }
 0x17c   : > { %v218_v19 = vmul.f32 %v375_v18, %v320_v17 }
 0x17e   : > { %v219_v21 = vmul.f32 %v218_v19, %v191_v3 }
 0x180   : > { %v226_v22 = vadd.f32 %v321_v20, %v219_v21 }
 0x182   : > { %227 = vst [vmem:[%s185_s10] sm:$0xff] %v226_v22 }
 0x183   : > { %419 = shalt.err (!%p416_p4)
}
 0x184   : > { %s420_s29 = scalar_lea.hbm %s623_s20, 128  ;;  %s424_s7 = scalar_lea.hbm %s670_s3, 256 }
 0x185   : > { %p421_p5 = scmp.ne.s32.totalorder %s623_s20, %s420_s29  ;;  %p425_p0 = scmp.lt.u32.totalorder %s623_s20, %s670_s3 }
 0x186   : > { %p426_p1 = scmp.lt.u32.totalorder %s424_s7, %s420_s29  ;;  %p428_p6 = scmp.lt.u32.totalorder %s420_s29, %s623_s20 }
 0x187   : > { %p422_p8 = pnand %p421_p5, %p679_p11 }
 0x188   : > { %p427_p3 = por %p426_p1, %p425_p0 }
 0x189   : > { %p423_p9 = pneg %p422_p8 }
 0x18a   : > { %p429_p12 = por %p428_p6, %p427_p3 }
 0x18c   : > { %p430_p13 = pnand %p429_p12, %p423_p9 }
 0x18e   : > { %433 = shalt.err (!%p430_p13)
}
 0x18f   : > { %328 = dma.vmem_to_hbm [thread:$0]  (%p679_p11), %s625_s11, 128, %s623_s20, %s229_s22  }
 0x190 PF: > { %s254_s6 = sand.u32 1, %s460_s12   ;;  %p680_p7 = scmp.ne.s32.totalorder %s675_s25, 0 }
 0x191   : > { %p681_p10 = scmp.ge.s32.totalorder %s472_s15, 2  ;;  %s255_s8 = scalar_lea.sflag [#allocation4], %s254_s6 }
 0x193   : > { %p335_p2 = pnand %p681_p10, %p680_p7 }
 0x195   : > { %455 = dma.done.wait (!%p335_p2), %s255_s8, 128  }
 0x196   : > { %457 = vsyncadd (!%p335_p2), %s255_s8, 4294967168  ;;  %p16_p4 = scmp.ge.s32.totalorder %s521_s18, 4   ;;  %s682_s12 = smov %s464_s13 }
 0x197   : > { %s683_s13 = smov %s468_s14  ;;  %s684_s14 = smov %s533_s21 }
 0x198   : > { %s685_s15 = smov %s521_s18  ;;  %18 = sbr.rel (!%p16_p4) target bundleno = 5 (0x5), region = 77 }
 0x19f   :  { %260 = vsyncpa [#allocation3], 1 }
 0x1a0   :  { %262 = vsyncpa [#allocation3 + $0x1], 1 }
 0x1a1   :  { %263 = vsyncpa [#allocation4], 1 }
 0x1a2   :  { %265 = vsyncpa [#allocation4 + $0x1], 1 }

</bundles_post_ra>
